<compile_context>
chip_gen: v5e
topology: v5e:2x2
jax: 0.10.0
libtpu: 0.0.40
codegen_flags: <defaults>
</compile_context>

<pallas_src>
import functools

import jax
import jax.numpy as jnp
from jax.experimental import pallas as pl
from jax.experimental.pallas import tpu as pltpu


def _round_up(x: int, m: int) -> int:
    return ((x + m - 1) // m) * m


def _mlp_fused_kernel(x_ref, *refs, num_layers: int, slope: float, compute_dtype):
    """Fused MLP: every Linear (+LeakyReLU) layer in one kernel body.

    refs = (w0, b0, w1, b1, ..., w_{L-1}, b_{L-1}, o_ref).
    Activations never leave the chip; matmuls accumulate in f32 on the MXU and
    are cast back to `compute_dtype` (bf16) between layers so every MXU pass
    runs at the native bf16 rate.
    """
    o_ref = refs[-1]
    h = x_ref[...]                               # (block_b, d_in), bf16
    for i in range(num_layers):
        w = refs[2 * i][...]                     # (d_in_i, d_out_i), bf16
        b = refs[2 * i + 1][...]                 # (1, d_out_i),      bf16
        y = jnp.dot(h, w, preferred_element_type=jnp.float32)
        y = y + b.astype(jnp.float32)            # bias add in f32
        if i < num_layers - 1:
            # LeakyReLU via a single VALU max (valid because 0 <= slope <= 1,
            # asserted at init).
            y = jnp.maximum(y, slope * y)
            h = y.astype(compute_dtype)          # bf16 for the next MXU pass
        else:
            h = y
    o_ref[...] = h.astype(o_ref.dtype)


def _fused_mlp_call(x, weights, biases, *, slope, block_b, logical_batch):
    """x: (Bp, d_in) in compute dtype, Bp % block_b == 0. Weights: (in, out)."""
    Bp, d_in = x.shape
    num_layers = len(weights)
    d_out = weights[-1].shape[1]
    grid = (Bp // block_b,)

    in_specs = [pl.BlockSpec((block_b, d_in), lambda i: (i, 0))]
    for w, b in zip(weights, biases):
        # Constant index_map: parameters stay VMEM-resident across grid steps
        # (the pipeline skips re-copies when the block index does not change).
        # TODO(synk): pipeline_mode=pl.Buffered(1) would also drop the second
        # (dead) parameter buffer; omitted since params are only a few KiB.
        in_specs.append(pl.BlockSpec(w.shape, lambda i: (0, 0)))
        in_specs.append(pl.BlockSpec(b.shape, lambda i: (0, 0)))
    out_spec = pl.BlockSpec((block_b, d_out), lambda i: (i, 0))

    itemsize = x.dtype.itemsize
    param_bytes = (sum(w.size * w.dtype.itemsize for w in weights)
                   + sum(b.size * b.dtype.itemsize for b in biases))

    # Advisory numbers for XLA: logical (un-padded) flops / bytes.
    flops = 2 * logical_batch * sum(w.shape[0] * w.shape[1] for w in weights)
    bytes_accessed = (logical_batch * d_in * itemsize
                      + param_bytes
                      + logical_batch * d_out * itemsize)

    # VMEM budget: double-buffered x/out streams + (double-buffered) resident
    # params + f32 intermediate activation chain, with generous headroom.
    max_width = max([d_in] + [w.shape[1] for w in weights])
    budget = (2 * block_b * d_in * itemsize
              + 2 * block_b * d_out * itemsize
              + 2 * param_bytes
              + 2 * block_b * max_width * 4)
    vmem_limit = int(max(16 * 2**20, min(64 * 2**20, 4 * budget)))

    kernel = functools.partial(_mlp_fused_kernel, num_layers=num_layers,
                               slope=slope, compute_dtype=x.dtype)

    args = [x]
    for w, b in zip(weights, biases):
        args += [w, b]

    return pl.pallas_call(
        kernel,
        out_shape=jax.ShapeDtypeStruct((Bp, d_out), x.dtype),
        grid_spec=pltpu.PrefetchScalarGridSpec(
            num_scalar_prefetch=0,
            grid=grid,
            in_specs=in_specs,
            out_specs=out_spec,
        ),
        compiler_params=pltpu.CompilerParams(
            dimension_semantics=("parallel",),   # batch axis -> both TCs on v7x
            vmem_limit_bytes=vmem_limit,
        ),
        cost_estimate=pl.CostEstimate(
            flops=flops, transcendentals=0, bytes_accessed=bytes_accessed),
    )(*args)


class MLPPallas:
    """Mirrors the PyTorch MLP module (inference forward), fused Pallas kernel."""

    def __init__(self, key, input_size, output_size,
                 dim_hidden=32, num_hidden=2, dim_hidden_fact=1.0,
                 p_dropout=0.1, negative_slope=0.01, compute_dtype=jnp.bfloat16):
        assert 0.0 <= negative_slope <= 1.0, (
            "max(y, slope*y) == LeakyReLU only holds for slope in [0, 1]")

        # Same layer-size list as the PyTorch __init__.
        dim_h = dim_hidden
        self.h_size = [input_size]
        for _ in range(num_hidden):
            self.h_size.append(dim_h)
            dim_h = int(dim_h * dim_hidden_fact)
        self.h_size.append(output_size)

        self.negative_slope = negative_slope
        self.p_dropout = p_dropout                  # inference: dropout is identity
        self.compute_dtype = jnp.dtype(compute_dtype)
        # TODO(synk): training-mode dropout (Bernoulli mask + 1/(1-p) scale) not
        # implemented; eval-mode forward (identity) is reproduced exactly.

        # PyTorch-Linear-style uniform fan-in init. f32 master copies are kept
        # for the reference; the kernel streams bf16 copies.
        self.weights_t = []      # (in, out), f32  -- reference only
        self.biases = []         # (1, out),  f32  -- reference only
        self.weights_t_k = []    # (in, out), bf16 -- kernel params
        self.biases_k = []       # (1, out),  bf16 -- kernel params
        for k in range(len(self.h_size) - 1):
            fan_in, fan_out = self.h_size[k], self.h_size[k + 1]
            key, wk, bk = jax.random.split(key, 3)
            bound = 1.0 / (fan_in ** 0.5)
            w = jax.random.uniform(wk, (fan_out, fan_in), jnp.float32,
                                   minval=-bound, maxval=bound)
            b = jax.random.uniform(bk, (fan_out,), jnp.float32,
                                   minval=-bound, maxval=bound)
            w_t = jnp.transpose(w)                  # (in, out)
            b2 = b.reshape(1, fan_out)
            self.weights_t.append(w_t)
            self.biases.append(b2)
            self.weights_t_k.append(w_t.astype(self.compute_dtype))
            self.biases_k.append(b2.astype(self.compute_dtype))

    def __call__(self, x):
        # x = self.drop(x) -> identity in eval mode.
        B, d_in = x.shape
        assert d_in == self.h_size[0]

        # Stream activations in bf16 (ideally the caller already supplies bf16
        # so this cast is a no-op / fused upstream).
        if x.dtype != self.compute_dtype:
            x = x.astype(self.compute_dtype)

        # Batch tiling: large tiles (per-step pipeline overhead ~0.35us, small
        # tiles waste HBM BW), but split so the grid has >= 2 steps whenever B
        # allows it (v7x megacore sharding of the batch axis; no-op on v5e/v6e).
        g = 16 if self.compute_dtype.itemsize == 2 else 8   # bf16 sublane pack
        cap = 1024
        if B <= g:
            block_b = B                      # single full-array block (legal)
        else:
            block_b = min(cap, _round_up((B + 1) // 2, g))
        Bp = _round_up(B, block_b)
        if Bp != B:
            x = jnp.pad(x, ((0, Bp - B), (0, 0)))            # batch pad only

        out = _fused_mlp_call(x, self.weights_t_k, self.biases_k,
                              slope=self.negative_slope, block_b=block_b,
                              logical_batch=B)
        # NOTE: rows beyond :B (batch padding) are bias-only garbage; never
        # read them outside this slice.
        return out[:B] if Bp != B else out


def mlp_reference_f32(x, weights_t, biases, slope=0.01):
    """Pure-JAX f32 reference of the original module (un-quantized params)."""
    n = len(weights_t)
    for i in range(n - 1):
        x = x @ weights_t[i] + biases[i]
        x = jnp.where(x >= 0, x, slope * x)
    return x @ weights_t[-1] + biases[-1]


def mlp_reference_matched(x, weights_k, biases_k, slope, compute_dtype):
    """Reference applying the same bf16 rounding points as the kernel."""
    h = x.astype(compute_dtype)
    n = len(weights_k)
    for i in range(n):
        y = jnp.dot(h.astype(jnp.float32), weights_k[i].astype(jnp.float32))
        y = y + biases_k[i].astype(jnp.float32)
        if i < n - 1:
            y = jnp.maximum(y, slope * y)
            h = y.astype(compute_dtype)
        else:
            h = y
    return h.astype(compute_dtype)


if __name__ == "__main__":
    key = jax.random.PRNGKey(0)
    key, xk, pk = jax.random.split(key, 3)

    batch = 8
    input_size = 32
    output_size = 16

    model = MLPPallas(pk, input_size, output_size,
                      dim_hidden=32, num_hidden=2,
                      dim_hidden_fact=1.0, p_dropout=0.1)

    x = jax.random.normal(xk, (batch, input_size), jnp.float32)

    out = jax.block_until_ready(model(x))
    assert out.shape == (batch, output_size), out.shape

    out_f32 = out.astype(jnp.float32)
    ref_matched = mlp_reference_matched(
        x, model.weights_t_k, model.biases_k,
        model.negative_slope, model.compute_dtype).astype(jnp.float32)
    ref_f32 = mlp_reference_f32(x, model.weights_t, model.biases,
                                model.negative_slope)

    assert jnp.allclose(out_f32, ref_matched, atol=2e-2, rtol=2e-2), \
        "mismatch vs bf16-matched reference"
    assert jnp.allclose(out_f32, ref_f32, atol=1e-1, rtol=1e-1), \
        "mismatch vs f32 reference"

    print("KERNEL_OK")
</pallas_src>

<mosaic_0001>
module attributes {stable_mosaic.version = 11 : i64} {
  func.func @_mlp_fused_kernel(%arg0: i32, %arg1: memref<8x32xbf16, #tpu.memory_space<vmem>>, %arg2: memref<32x32xbf16, #tpu.memory_space<vmem>>, %arg3: memref<1x32xbf16, #tpu.memory_space<vmem>>, %arg4: memref<32x32xbf16, #tpu.memory_space<vmem>>, %arg5: memref<1x32xbf16, #tpu.memory_space<vmem>>, %arg6: memref<32x16xbf16, #tpu.memory_space<vmem>>, %arg7: memref<1x16xbf16, #tpu.memory_space<vmem>>, %arg8: memref<8x16xbf16, #tpu.memory_space<vmem>>) attributes {dimension_semantics = [#tpu.dimension_semantics<parallel>], iteration_bounds = array<i64: 1>, scalar_prefetch = 0 : i64, scratch_operands = 0 : i64, tpu.core_type = #tpu.core_type<tc>, window_params = [{transform_indices = @transform_0, window_bounds = array<i64: 8, 32>}, {pipeline_mode = #tpu.pipeline_mode<synchronous>, transform_indices = @transform_1, window_bounds = array<i64: 32, 32>}, {pipeline_mode = #tpu.pipeline_mode<synchronous>, transform_indices = @transform_2, window_bounds = array<i64: 1, 32>}, {pipeline_mode = #tpu.pipeline_mode<synchronous>, transform_indices = @transform_3, window_bounds = array<i64: 32, 32>}, {pipeline_mode = #tpu.pipeline_mode<synchronous>, transform_indices = @transform_4, window_bounds = array<i64: 1, 32>}, {pipeline_mode = #tpu.pipeline_mode<synchronous>, transform_indices = @transform_5, window_bounds = array<i64: 32, 16>}, {pipeline_mode = #tpu.pipeline_mode<synchronous>, transform_indices = @transform_6, window_bounds = array<i64: 1, 16>}, {transform_indices = @transform_7, window_bounds = array<i64: 8, 16>}]} {
    %c0 = arith.constant 0 : index
    %c0_0 = arith.constant 0 : index
    %0 = vector.load %arg1[%c0, %c0_0] : memref<8x32xbf16, #tpu.memory_space<vmem>>, vector<8x32xbf16>
    %c0_1 = arith.constant 0 : index
    %c0_2 = arith.constant 0 : index
    %1 = vector.load %arg2[%c0_1, %c0_2] : memref<32x32xbf16, #tpu.memory_space<vmem>>, vector<32x32xbf16>
    %c0_3 = arith.constant 0 : index
    %c0_4 = arith.constant 0 : index
    %2 = vector.load %arg3[%c0_3, %c0_4] : memref<1x32xbf16, #tpu.memory_space<vmem>>, vector<1x32xbf16>
    %cst = arith.constant dense<0.000000e+00> : vector<8x32xf32>
    %3 = tpu.matmul %0, %1, %cst {dimension_numbers = #tpu.dot_dimension_numbers<[1], [0], [0], [1], [0, 0, 1, 1], [], []>} : vector<8x32xbf16>, vector<32x32xbf16>, vector<8x32xf32> -> vector<8x32xf32>
    %4 = arith.extf %2 : vector<1x32xbf16> to vector<1x32xf32>
    %5 = vector.broadcast %4 : vector<1x32xf32> to vector<8x32xf32>
    %6 = arith.addf %3, %5 : vector<8x32xf32>
    %cst_5 = arith.constant 0.00999999977 : f32
    %7 = vector.broadcast %cst_5 : f32 to vector<8x32xf32>
    %8 = arith.mulf %7, %6 : vector<8x32xf32>
    %9 = arith.maximumf %6, %8 : vector<8x32xf32>
    %10 = arith.truncf %9 : vector<8x32xf32> to vector<8x32xbf16>
    %c0_6 = arith.constant 0 : index
    %c0_7 = arith.constant 0 : index
    %11 = vector.load %arg4[%c0_6, %c0_7] : memref<32x32xbf16, #tpu.memory_space<vmem>>, vector<32x32xbf16>
    %c0_8 = arith.constant 0 : index
    %c0_9 = arith.constant 0 : index
    %12 = vector.load %arg5[%c0_8, %c0_9] : memref<1x32xbf16, #tpu.memory_space<vmem>>, vector<1x32xbf16>
    %cst_10 = arith.constant dense<0.000000e+00> : vector<8x32xf32>
    %13 = tpu.matmul %10, %11, %cst_10 {dimension_numbers = #tpu.dot_dimension_numbers<[1], [0], [0], [1], [0, 0, 1, 1], [], []>} : vector<8x32xbf16>, vector<32x32xbf16>, vector<8x32xf32> -> vector<8x32xf32>
    %14 = arith.extf %12 : vector<1x32xbf16> to vector<1x32xf32>
    %15 = vector.broadcast %14 : vector<1x32xf32> to vector<8x32xf32>
    %16 = arith.addf %13, %15 : vector<8x32xf32>
    %cst_11 = arith.constant 0.00999999977 : f32
    %17 = vector.broadcast %cst_11 : f32 to vector<8x32xf32>
    %18 = arith.mulf %17, %16 : vector<8x32xf32>
    %19 = arith.maximumf %16, %18 : vector<8x32xf32>
    %20 = arith.truncf %19 : vector<8x32xf32> to vector<8x32xbf16>
    %c0_12 = arith.constant 0 : index
    %c0_13 = arith.constant 0 : index
    %21 = vector.load %arg6[%c0_12, %c0_13] : memref<32x16xbf16, #tpu.memory_space<vmem>>, vector<32x16xbf16>
    %c0_14 = arith.constant 0 : index
    %c0_15 = arith.constant 0 : index
    %22 = vector.load %arg7[%c0_14, %c0_15] : memref<1x16xbf16, #tpu.memory_space<vmem>>, vector<1x16xbf16>
    %cst_16 = arith.constant dense<0.000000e+00> : vector<8x16xf32>
    %23 = tpu.matmul %20, %21, %cst_16 {dimension_numbers = #tpu.dot_dimension_numbers<[1], [0], [0], [1], [0, 0, 1, 1], [], []>} : vector<8x32xbf16>, vector<32x16xbf16>, vector<8x16xf32> -> vector<8x16xf32>
    %24 = arith.extf %22 : vector<1x16xbf16> to vector<1x16xf32>
    %25 = vector.broadcast %24 : vector<1x16xf32> to vector<8x16xf32>
    %26 = arith.addf %23, %25 : vector<8x16xf32>
    %27 = arith.truncf %26 : vector<8x16xf32> to vector<8x16xbf16>
    %c0_17 = arith.constant 0 : index
    %c0_18 = arith.constant 0 : index
    %28 = vector.load %arg8[%c0_17, %c0_18] : memref<8x16xbf16, #tpu.memory_space<vmem>>, vector<8x16xbf16>
    tpu.vector_store %arg8[%c0_17, %c0_18], %27 {strides = array<i32>} : memref<8x16xbf16, #tpu.memory_space<vmem>>, vector<8x16xbf16>,
    return
  }
  func.func @transform_0(%arg0: i32) -> (i32, i32) {
    %c0_i32 = arith.constant 0 : i32
    %c0_i32_0 = arith.constant 0 : i32
    return %arg0, %c0_i32 : i32, i32
  }
  func.func @transform_1(%arg0: i32) -> (i32, i32) {
    %c0_i32 = arith.constant 0 : i32
    %c0_i32_0 = arith.constant 0 : i32
    %c0_i32_1 = arith.constant 0 : i32
    return %c0_i32, %c0_i32_0 : i32, i32
  }
  func.func @transform_2(%arg0: i32) -> (i32, i32) {
    %c0_i32 = arith.constant 0 : i32
    %c0_i32_0 = arith.constant 0 : i32
    %c0_i32_1 = arith.constant 0 : i32
    return %c0_i32, %c0_i32_0 : i32, i32
  }
  func.func @transform_3(%arg0: i32) -> (i32, i32) {
    %c0_i32 = arith.constant 0 : i32
    %c0_i32_0 = arith.constant 0 : i32
    %c0_i32_1 = arith.constant 0 : i32
    return %c0_i32, %c0_i32_0 : i32, i32
  }
  func.func @transform_4(%arg0: i32) -> (i32, i32) {
    %c0_i32 = arith.constant 0 : i32
    %c0_i32_0 = arith.constant 0 : i32
    %c0_i32_1 = arith.constant 0 : i32
    return %c0_i32, %c0_i32_0 : i32, i32
  }
  func.func @transform_5(%arg0: i32) -> (i32, i32) {
    %c0_i32 = arith.constant 0 : i32
    %c0_i32_0 = arith.constant 0 : i32
    %c0_i32_1 = arith.constant 0 : i32
    return %c0_i32, %c0_i32_0 : i32, i32
  }
  func.func @transform_6(%arg0: i32) -> (i32, i32) {
    %c0_i32 = arith.constant 0 : i32
    %c0_i32_0 = arith.constant 0 : i32
    %c0_i32_1 = arith.constant 0 : i32
    return %c0_i32, %c0_i32_0 : i32, i32
  }
  func.func @transform_7(%arg0: i32) -> (i32, i32) {
    %c0_i32 = arith.constant 0 : i32
    %c0_i32_0 = arith.constant 0 : i32
    return %arg0, %c0_i32 : i32, i32
  }
}

</mosaic_0001>

<bundles_post_ra>
// kernel: tpu_custom_call.1
= control target key start
LH: loop header
LB: loop body
LE: loop exit
PB: predicated region body
PF: predicated region fallthrough
CT: control target
= control target key end

     0   :  { %12 = vsyncpa [#allocation3], 0  ;;  %s343_s0 = inlined_call_operand.vmem [shape: bf16[8,32], index: 0, kind: input, shape index: {}]   ;;  %s344_s1 = inlined_call_operand.vmem [shape: bf16[32,32], index: 1, kind: input, shape index: {}]   ;;  %s345_s2 = inlined_call_operand.vmem [shape: bf16[1,32], index: 2, kind: input, shape index: {}]   ;;  %s346_s3 = inlined_call_operand.hbm [shape: bf16[32,32], index: 3, kind: input, shape index: {}]   ;;  %s347_s4 = inlined_call_operand.vmem [shape: bf16[1,32], index: 4, kind: input, shape index: {}]   ;;  %s348_s5 = inlined_call_operand.vmem [shape: bf16[32,16], index: 5, kind: input, shape index: {}]   ;;  %s349_s6 = inlined_call_operand.vmem [shape: bf16[1,16], index: 6, kind: input, shape index: {}]   ;;  %s350_s7 = inlined_call_operand.hbm [shape: bf16[8,16], index: 7, kind: output, shape index: {}]  }
   0x1   :  { %13 = vsyncpa [#allocation4], 0  ;;  %s24_s26 = sshll.u32 %s346_s3, 4  ;;  %s266_s27 = smov [#allocation2]   ;;  %s25_s26 = int_to_ptr.hbm [resolvable:$true] %s24_s26 }
   0x2   :  { %s26_s28 = sshll.u32 %s266_s27, 4  ;;  %s267_s29 = smov 64   ;;  %s27_s28 = int_to_ptr.vmem [resolvable:$true] %s26_s28 }
   0x3   :  { %s268_s30 = smov 4  }
   0x4   :  { %32 = dma.hbm_to_vmem [thread:$0]  %s25_s26, 256, %s27_s28, [#allocation3], %s267_s29, %s267_s29, %s268_s30  }
   0x5   :  { %262 = dma.done.wait [#allocation3], 256  }
   0x6   :  { %263 = vsyncadd [#allocation3], 4294967040  ;;  %v205_v0 = vld [vmem:[%s344_s1 + $0x8] sm:$0xff]  ;;  %v204_v1 = vld [vmem:[%s344_s1] sm:$0xff]  ;;  %vm64_vm0 = vcmask 261120   ;;  %s167_s22 = sshll.u32 %s350_s7, 4  ;;  %s168_s22 = int_to_ptr.hbm [resolvable:$true] %s167_s22 }
   0x7   :  { %74 = vmatpush.bf16.msra.mxu0 %v205_v0  ;;  %v44_v2 = vld [vmem:[%s343_s0] sm:$0xf]  ;;  %v207_v3 = vld [vmem:[#allocation2 + $0x8] sm:$0xff]  ;;  %vm158_vm1 = vcmask 125952  }
   0x8   :  { %112 = vmatpush.bf16.msra.mxu1 %v207_v3  ;;  %v206_v4 = vld [vmem:[#allocation2] sm:$0xff]  ;;  %v209_v14 = vld [vmem:[%s348_s5 + $0x8] sm:$0xff] }
   0x9   :  { %v49_v5 = vld [vmem:[%s345_s2] sm:$0x1]  ;;  %150 = vmatpush.bf16.msra.mxu2 %v209_v14 }
   0xa   :  { %v50_v6 = vunpack.c.l.bf16 %v49_v5  ;;  %v208_v15 = vld [vmem:[%s348_s5] sm:$0xff]  ;;  %s269_s5 = smov [#allocation5]  }
   0xb   :  { %75 = vmatpush.bf16.msra.mxu0 %v204_v1  ;;  %v88_v16 = vld [vmem:[%s347_s4] sm:$0x1]  ;;  %s165_s20 = sshll.u32 %s269_s5, 4  ;;  %s166_s20 = int_to_ptr.vmem [resolvable:$true] %s165_s20 }
   0xc   :  { %113 = vmatpush.bf16.msra.mxu1 %v206_v4  ;;  %v51_v7 = vperm.slane %v50_v6, 0  ;;  %v89_v17 = vunpack.c.l.bf16 %v88_v16  ;;  %v126_v25 = vld [vmem:[%s349_s6] sm:$0x1] }
   0xd   :  { %151 = vmatpush.bf16.msra.mxu2 %v208_v15  ;;  %v127_v26 = vunpack.c.l.bf16 %v126_v25 }
   0xe   :  { %185 = vmatmul.msk.bf16.vlgmr.msra.gmra.mxu0 %vm64_vm0, %v44_v2  ;;  %v90_v18 = vperm.slane %v89_v17, 0 }
   0xf   :  { %v128_v27 = vperm.slane %v127_v26, 0 }
  0x8b   :  { %v77_v8 = vpop.f32.mrf.mxu0 }
  0x8c   :  { %v78_v9 = vadd.f32 %v77_v8, %v51_v7 }
  0x8e   :  { %v81_v10 = vmul.f32 0.01, %v78_v9 }
  0x90   :  { %v82_v11 = vmax.f32 %v78_v9, %v81_v10 }
  0x92   :  { %v83_v12 = vpack.c.bf16 %v82_v11, %v82_v11 }
  0x93   :  { %v79_v13 = vpop.f32.mrf.mxu0 }
  0x94   :  { %194 = vmatmul.msk.bf16.vlgmr.msra.gmra.mxu1 %vm64_vm0, %v83_v12 }
 0x111   :  { %v115_v19 = vpop.f32.mrf.mxu1 }
 0x112   :  { %v116_v20 = vadd.f32 %v115_v19, %v90_v18 }
 0x114   :  { %v119_v21 = vmul.f32 0.01, %v116_v20 }
 0x116   :  { %v120_v22 = vmax.f32 %v116_v20, %v119_v21 }
 0x118   :  { %v121_v23 = vpack.c.bf16 %v120_v22, %v120_v22 }
 0x119   :  { %v117_v24 = vpop.f32.mrf.mxu1 }
 0x11a   :  { %203 = vmatmul.msk.bf16.vlgmr.msra.gmra.mxu2 %vm64_vm0, %v121_v23 }
 0x19d   :  { %v153_v28 = vpop.f32.mrf.mxu2 }
 0x19e   :  { %v154_v29 = vadd.f32 %v153_v28, %v128_v27 }
 0x1a0   :  { %v157_v30 = vpack.c.bf16 %v154_v29, %v154_v29 }
 0x1a2   :  { %159 = vst.msk [vmem:[#allocation5] sm:$0xf] %vm158_vm1, %v157_v30 }
 0x1a3   :  { %170 = dma.vmem_to_hbm [thread:$0]  %s166_s20, 64, %s168_s22, [#allocation4]  }
 0x1a5   :  { %v155_v31 = vpop.f32.mrf.mxu2 }
 0x1a6   :  { %264 = dma.done.wait [#allocation4], 64  }
 0x1a7   :  { %265 = vsyncadd [#allocation4], 4294967232 }
 0x1a8   :  { %175 = vsyncpa [#allocation3], 1 }
 0x1a9   :  { %176 = vsyncpa [#allocation4], 1 }

</bundles_post_ra>
